<compile_context>
chip_gen: v5e
topology: v5e:2x2
jax: 0.10.0
libtpu: 0.0.40
codegen_flags: <defaults>
</compile_context>

<pallas_src>
import functools

import numpy as np

import jax
import jax.numpy as jnp
from jax import lax
from jax.experimental import pallas as pl
from jax.experimental.pallas import tpu as pltpu


def _make_bn_relu_conv_kernel(KH, stride, pad, Ho):
    def kernel(x_ref, scale_ref, shift_ref, w_ref, b_ref, out_ref):
        # x_ref:     (Nb, H, W*Cin)      f32   (lane-dense: W*Cin on lanes)
        # scale/shift: (1, W*Cin)        f32   (BN affine folded per channel)
        # w_ref:     (KH*W*Cin, Wo*Cout) bf16  (im2col weight band)
        # b_ref:     (1, Wo*Cout)        f32
        # out_ref:   (Nb, Ho, Wo*Cout)   f32
        Nb, H, WC = x_ref.shape
        WoCout = out_ref.shape[2]

        # Fused BatchNorm (folded scale/shift) + ReLU in f32 on the VPU; one
        # single cast to bf16 for the MXU lhs.
        a = jnp.maximum(x_ref[...] * scale_ref[...] + shift_ref[...], 0.0)
        a = a.astype(jnp.bfloat16)

        # H zero padding (post-ReLU, matching Conv2d's zero padding of the
        # activation) as a small sublane concat; W padding is encoded as zero
        # taps inside the weight band, so no padded VMEM scratch is needed.
        if pad > 0:
            zrows = jnp.zeros((Nb, pad, WC), jnp.bfloat16)
            a = jnp.concatenate([zrows, a, zrows], axis=1)        # (Nb, Hp, WC)

        # im2col: the KH (strided) row windows concatenated along lanes -> one
        # MXU contraction over KH*W*Cin instead of KH small banded matmuls.
        cols = []
        for kh in range(KH):
            if stride == 1:
                cols.append(a[:, kh:kh + Ho, :])
            else:
                # Single strided gather per kh (pre-gathered once, not per-tap).
                cols.append(lax.slice(a, (0, kh, 0),
                                      (Nb, kh + (Ho - 1) * stride + 1, WC),
                                      (1, stride, 1)))
        lhs = jnp.concatenate(cols, axis=-1).reshape(Nb * Ho, KH * WC)

        # One bf16 MXU matmul with f32 accumulation; M = Nb*Ho, K = KH*W*Cin.
        acc = jnp.dot(lhs, w_ref[...], preferred_element_type=jnp.float32)
        out_ref[...] = (acc + b_ref[...]).reshape(Nb, Ho, WoCout).astype(out_ref.dtype)

    return kernel


def _pick_block_n(N, Ho, target_m=256):
    """Largest divisor of N with Nb*Ho <= target_m (fill the MXU M axis)."""
    nb = max(1, min(N, max(1, target_m // max(Ho, 1))))
    while N % nb:
        nb -= 1
    return nb


@functools.partial(jax.jit, static_argnames=("stride", "padding", "eps"))
def bn_relu_conv(x_nchw, gamma, beta, conv_w, conv_b, *, stride=1, padding=1,
                 eps=1e-5):
    N, Cin, H, W = x_nchw.shape
    Cout, _, KH, KW = conv_w.shape
    Ho = (H + 2 * padding - KH) // stride + 1
    Wo = (W + 2 * padding - KW) // stride + 1

    x_f32 = x_nchw.astype(jnp.float32)

    # ---- BatchNorm batch statistics (training mode, biased variance), plain
    # jnp so XLA fuses them; two-pass variance avoids cancellation.
    mean = jnp.mean(x_f32, axis=(0, 2, 3))
    var = jnp.mean(jnp.square(x_f32 - mean[None, :, None, None]), axis=(0, 2, 3))
    inv_std = lax.rsqrt(var + eps)
    scale = gamma.astype(jnp.float32) * inv_std
    shift = beta.astype(jnp.float32) - mean * scale
    scale_row = jnp.tile(scale, W).reshape(1, W * Cin)   # per-pixel channel tile
    shift_row = jnp.tile(shift, W).reshape(1, W * Cin)

    # NCHW -> NHWC -> (N, H, W*Cin): W*Cin rides the 128-lane axis.
    x_flat = jnp.transpose(x_f32, (0, 2, 3, 1)).reshape(N, H, W * Cin)

    # ---- im2col weight band via one-hot placement einsum.
    #   band[(kh*W + w_in)*Cin + ci, wo*Cout + co] = conv_w[co, ci, kh, kw]
    #   where w_in = wo*stride + kw - padding, and out-of-range w_in simply has
    #   no tap (zero) => W zero-padding is folded into the band.
    w_khkw = jnp.transpose(conv_w, (2, 3, 1, 0)).astype(jnp.float32)  # (KH,KW,Cin,Cout)
    kw_i, w_i, wo_i = np.arange(KW), np.arange(W), np.arange(Wo)
    placement = (w_i[None, :, None] ==
                 wo_i[None, None, :] * stride + kw_i[:, None, None] - padding
                 ).astype(np.float32)                                  # (KW, W, Wo)
    w_band = jnp.einsum("hkio,kwq->hwiqo", w_khkw, placement)          # (KH,W,Cin,Wo,Cout)
    w_band = w_band.reshape(KH * W * Cin, Wo * Cout).astype(jnp.bfloat16)
    bias_row = jnp.tile(conv_b.astype(jnp.float32), Wo).reshape(1, Wo * Cout)

    # ---- single fused Pallas pass: BN + ReLU + im2col + one MXU matmul.
    Nb = _pick_block_n(N, Ho)
    kernel = _make_bn_relu_conv_kernel(KH, stride, padding, Ho)
    out_flat = pl.pallas_call(
        kernel,
        out_shape=jax.ShapeDtypeStruct((N, Ho, Wo * Cout), jnp.float32),
        grid=(N // Nb,),
        in_specs=[
            pl.BlockSpec((Nb, H, W * Cin), lambda n: (n, 0, 0)),
            pl.BlockSpec((1, W * Cin), lambda n: (0, 0)),
            pl.BlockSpec((1, W * Cin), lambda n: (0, 0)),
            pl.BlockSpec((KH * W * Cin, Wo * Cout), lambda n: (0, 0)),
            pl.BlockSpec((1, Wo * Cout), lambda n: (0, 0)),
        ],
        out_specs=pl.BlockSpec((Nb, Ho, Wo * Cout), lambda n: (n, 0, 0)),
        compiler_params=pltpu.CompilerParams(dimension_semantics=("parallel",)),
    )(x_flat, scale_row, shift_row, w_band, bias_row)

    # (N, Ho, Wo*Cout) -> (N, Ho, Wo, Cout) -> NCHW.
    out = out_flat.reshape(N, Ho, Wo, Cout)
    return jnp.transpose(out, (0, 3, 1, 2))


if __name__ == "__main__":
    key = jax.random.PRNGKey(0)
    k1, k2, k3, k4, k5 = jax.random.split(key, 5)

    # Small shapes consistent with BnReluConv(in=4, out=8, kernel=3, stride=1, pad=1).
    N, Cin, H, W = 2, 4, 16, 16
    Cout, K, stride, padding = 8, 3, 1, 1

    x = jax.random.normal(k1, (N, Cin, H, W), jnp.float32)
    gamma = 1.0 + 0.1 * jax.random.normal(k2, (Cin,), jnp.float32)
    beta = 0.1 * jax.random.normal(k3, (Cin,), jnp.float32)
    conv_w = 0.1 * jax.random.normal(k4, (Cout, Cin, K, K), jnp.float32)
    conv_b = 0.1 * jax.random.normal(k5, (Cout,), jnp.float32)

    out = bn_relu_conv(x, gamma, beta, conv_w, conv_b,
                       stride=stride, padding=padding)
    out = jax.block_until_ready(out)

    # Plain-JAX reference (training-mode BN with biased variance, like PyTorch).
    eps = 1e-5
    mean = x.mean(axis=(0, 2, 3), keepdims=True)
    var = x.var(axis=(0, 2, 3), keepdims=True)
    a = (x - mean) / jnp.sqrt(var + eps) * gamma[None, :, None, None] \
        + beta[None, :, None, None]
    a = jnp.maximum(a, 0.0)
    ref = lax.conv_general_dilated(
        a, conv_w, window_strides=(stride, stride),
        padding=[(padding, padding), (padding, padding)],
        dimension_numbers=("NCHW", "OIHW", "NCHW"),
    ) + conv_b[None, :, None, None]

    assert out.shape == ref.shape, (out.shape, ref.shape)
    max_err = float(jnp.max(jnp.abs(out - ref)))
    # Tolerance reflects bf16 MXU operands vs the f32 reference (intentional trade).
    assert jnp.allclose(out, ref, rtol=2e-2, atol=2e-2), max_err
    print("KERNEL_OK")
</pallas_src>

<mosaic_0001>
module attributes {stable_mosaic.version = 11 : i64} {
  func.func @kernel(%arg0: i32, %arg1: memref<2x16x64xf32, #tpu.memory_space<vmem>>, %arg2: memref<1x64xf32, #tpu.memory_space<vmem>>, %arg3: memref<1x64xf32, #tpu.memory_space<vmem>>, %arg4: memref<192x128xbf16, #tpu.memory_space<vmem>>, %arg5: memref<1x128xf32, #tpu.memory_space<vmem>>, %arg6: memref<2x16x128xf32, #tpu.memory_space<vmem>>) attributes {dimension_semantics = [#tpu.dimension_semantics<parallel>], iteration_bounds = array<i64: 1>, scalar_prefetch = 0 : i64, scratch_operands = 0 : i64, tpu.core_type = #tpu.core_type<tc>, window_params = [{transform_indices = @transform_0, window_bounds = array<i64: 2, 16, 64>}, {pipeline_mode = #tpu.pipeline_mode<synchronous>, transform_indices = @transform_1, window_bounds = array<i64: 1, 64>}, {pipeline_mode = #tpu.pipeline_mode<synchronous>, transform_indices = @transform_2, window_bounds = array<i64: 1, 64>}, {pipeline_mode = #tpu.pipeline_mode<synchronous>, transform_indices = @transform_3, window_bounds = array<i64: 192, 128>}, {pipeline_mode = #tpu.pipeline_mode<synchronous>, transform_indices = @transform_4, window_bounds = array<i64: 1, 128>}, {transform_indices = @transform_5, window_bounds = array<i64: 2, 16, 128>}]} {
    %c0 = arith.constant 0 : index
    %c0_0 = arith.constant 0 : index
    %c0_1 = arith.constant 0 : index
    %0 = vector.load %arg1[%c0, %c0_0, %c0_1] : memref<2x16x64xf32, #tpu.memory_space<vmem>>, vector<2x16x64xf32>
    %c0_2 = arith.constant 0 : index
    %c0_3 = arith.constant 0 : index
    %1 = vector.load %arg2[%c0_2, %c0_3] : memref<1x64xf32, #tpu.memory_space<vmem>>, vector<1x64xf32>
    %2 = vector.shape_cast %1 : vector<1x64xf32> to vector<1x1x64xf32>
    %3 = vector.broadcast %2 : vector<1x1x64xf32> to vector<2x16x64xf32>
    %4 = arith.mulf %0, %3 : vector<2x16x64xf32>
    %c0_4 = arith.constant 0 : index
    %c0_5 = arith.constant 0 : index
    %5 = vector.load %arg3[%c0_4, %c0_5] : memref<1x64xf32, #tpu.memory_space<vmem>>, vector<1x64xf32>
    %6 = vector.shape_cast %5 : vector<1x64xf32> to vector<1x1x64xf32>
    %7 = vector.broadcast %6 : vector<1x1x64xf32> to vector<2x16x64xf32>
    %8 = arith.addf %4, %7 : vector<2x16x64xf32>
    %cst = arith.constant 0.000000e+00 : f32
    %9 = vector.broadcast %cst : f32 to vector<2x16x64xf32>
    %10 = arith.maximumf %8, %9 : vector<2x16x64xf32>
    %11 = arith.truncf %10 : vector<2x16x64xf32> to vector<2x16x64xbf16>
    %cst_6 = arith.constant 0.000000e+00 : bf16
    %12 = vector.broadcast %cst_6 : bf16 to vector<2x1x64xbf16>
    %13 = tpu.concatenate %12, %11, %12 in 1 : vector<2x1x64xbf16>, vector<2x16x64xbf16>, vector<2x1x64xbf16> -> vector<2x18x64xbf16>
    %14 = vector.extract_strided_slice %13 {offsets = [0, 0, 0], sizes = [2, 16, 64], strides = [1, 1, 1]} : vector<2x18x64xbf16> to vector<2x16x64xbf16>
    %15 = vector.extract_strided_slice %13 {offsets = [0, 1, 0], sizes = [2, 16, 64], strides = [1, 1, 1]} : vector<2x18x64xbf16> to vector<2x16x64xbf16>
    %16 = vector.extract_strided_slice %13 {offsets = [0, 2, 0], sizes = [2, 16, 64], strides = [1, 1, 1]} : vector<2x18x64xbf16> to vector<2x16x64xbf16>
    %17 = tpu.concatenate %14, %15, %16 in 2 : vector<2x16x64xbf16>, vector<2x16x64xbf16>, vector<2x16x64xbf16> -> vector<2x16x192xbf16>
    %18 = vector.shape_cast %17 : vector<2x16x192xbf16> to vector<32x192xbf16>
    %c0_7 = arith.constant 0 : index
    %c0_8 = arith.constant 0 : index
    %19 = vector.load %arg4[%c0_7, %c0_8] : memref<192x128xbf16, #tpu.memory_space<vmem>>, vector<192x128xbf16>
    %cst_9 = arith.constant dense<0.000000e+00> : vector<32x128xf32>
    %20 = tpu.matmul %18, %19, %cst_9 {dimension_numbers = #tpu.dot_dimension_numbers<[1], [0], [0], [1], [0, 0, 1, 1], [], []>} : vector<32x192xbf16>, vector<192x128xbf16>, vector<32x128xf32> -> vector<32x128xf32>
    %c0_10 = arith.constant 0 : index
    %c0_11 = arith.constant 0 : index
    %21 = vector.load %arg5[%c0_10, %c0_11] : memref<1x128xf32, #tpu.memory_space<vmem>>, vector<1x128xf32>
    %22 = vector.broadcast %21 : vector<1x128xf32> to vector<32x128xf32>
    %23 = arith.addf %20, %22 : vector<32x128xf32>
    %24 = vector.shape_cast %23 : vector<32x128xf32> to vector<2x16x128xf32>
    %c0_12 = arith.constant 0 : index
    %c0_13 = arith.constant 0 : index
    %c0_14 = arith.constant 0 : index
    %25 = vector.load %arg6[%c0_12, %c0_13, %c0_14] : memref<2x16x128xf32, #tpu.memory_space<vmem>>, vector<2x16x128xf32>
    tpu.vector_store %arg6[%c0_12, %c0_13, %c0_14], %24 {strides = array<i32>} : memref<2x16x128xf32, #tpu.memory_space<vmem>>, vector<2x16x128xf32>,
    return
  }
  func.func @transform_0(%arg0: i32) -> (i32, i32, i32) {
    %c0_i32 = arith.constant 0 : i32
    %c0_i32_0 = arith.constant 0 : i32
    %c0_i32_1 = arith.constant 0 : i32
    return %arg0, %c0_i32, %c0_i32_0 : i32, i32, i32
  }
  func.func @transform_1(%arg0: i32) -> (i32, i32) {
    %c0_i32 = arith.constant 0 : i32
    %c0_i32_0 = arith.constant 0 : i32
    %c0_i32_1 = arith.constant 0 : i32
    return %c0_i32, %c0_i32_0 : i32, i32
  }
  func.func @transform_2(%arg0: i32) -> (i32, i32) {
    %c0_i32 = arith.constant 0 : i32
    %c0_i32_0 = arith.constant 0 : i32
    %c0_i32_1 = arith.constant 0 : i32
    return %c0_i32, %c0_i32_0 : i32, i32
  }
  func.func @transform_3(%arg0: i32) -> (i32, i32) {
    %c0_i32 = arith.constant 0 : i32
    %c0_i32_0 = arith.constant 0 : i32
    %c0_i32_1 = arith.constant 0 : i32
    return %c0_i32, %c0_i32_0 : i32, i32
  }
  func.func @transform_4(%arg0: i32) -> (i32, i32) {
    %c0_i32 = arith.constant 0 : i32
    %c0_i32_0 = arith.constant 0 : i32
    %c0_i32_1 = arith.constant 0 : i32
    return %c0_i32, %c0_i32_0 : i32, i32
  }
  func.func @transform_5(%arg0: i32) -> (i32, i32, i32) {
    %c0_i32 = arith.constant 0 : i32
    %c0_i32_0 = arith.constant 0 : i32
    %c0_i32_1 = arith.constant 0 : i32
    return %arg0, %c0_i32, %c0_i32_0 : i32, i32, i32
  }
}

</mosaic_0001>

<bundles_post_ra>
// kernel: tile.18
= control target key start
LH: loop header
LB: loop body
LE: loop exit
PB: predicated region body
PF: predicated region fallthrough
CT: control target
= control target key end

     0   :  { %s28_s0 = inlined_call_operand.vmem [shape: f32[4], index: 0, kind: input, shape index: {}]   ;;  %s29_s1 = inlined_call_operand.vmem [shape: f32[16,4], index: 1, kind: output, shape index: {}]  }
   0x1   :  { %v4_v0 = vld [vmem:[%s28_s0] ss:$0 sm:$0xff] }
   0x2   :  { %5 = vst [vmem:[%s29_s1] sm:$0xff] %v4_v0 }
   0x3   :  { %8 = vst [vmem:[%s29_s1 + $0x8] sm:$0xff] %v4_v0 }

// kernel: tile.19
= control target key start
LH: loop header
LB: loop body
LE: loop exit
PB: predicated region body
PF: predicated region fallthrough
CT: control target
= control target key end

     0   :  { %s131_s10 = smov 60   ;;  %s132_s11 = smov 52   ;;  %vm3_vm0 = vcmask 31744   ;;  %vm9_vm1 = vcmask 523744   ;;  %vm15_vm2 = vcmask 490944   ;;  %vm21_vm3 = vcmask 458144   ;;  %s207_s0 = inlined_call_operand.vmem [shape: f32[16,4], index: 0, kind: input, shape index: {}]   ;;  %s208_s1 = inlined_call_operand.vmem [shape: f32[1,64], index: 1, kind: output, shape index: {}]  }
   0x1   :  { %v101_v0 = vld [vmem:[%s207_s0 + $0xf] sm:$0x1]   ;;  %v103_v1 = vld [vmem:[%s207_s0 + $0xd] sm:$0x1]   ;;  %v105_v2 = vld [vmem:[%s207_s0 + $0xb] sm:$0x1]  }
   0x2   :  { %7 = vrot.lane.b32.xlu0 %v101_v0, %s131_s10  ;;  %19 = vrot.lane.b32.xlu1 %v103_v1, %s132_s11  ;;  %s133_s14 = smov 44   ;;  %v102_v3 = vld [vmem:[%s207_s0 + $0xe] sm:$0x1]   ;;  %v104_v4 = vld [vmem:[%s207_s0 + $0xc] sm:$0x1]   ;;  %s134_s19 = smov 56  }
   0x3   :  { %31 = vrot.lane.b32.xlu2 %v105_v2, %s133_s14  ;;  %s135_s20 = smov 48   ;;  %v106_v5 = vld [vmem:[%s207_s0 + $0xa] sm:$0x1]   ;;  %s136_s23 = smov 40   ;;  %v107_v6 = vld [vmem:[%s207_s0 + $0x9] sm:$0x1]  }
   0x4   :  { %v108_v7 = vld [vmem:[%s207_s0 + $0x8] sm:$0x1]   ;;  %s137_s28 = smov 36   ;;  %s138_s29 = smov 32   ;;  %v109_v8 = vld [vmem:[%s207_s0 + $0x7] sm:$0x1]  }
   0x5   :  { %s139_s3 = smov 28   ;;  %v110_v9 = vld [vmem:[%s207_s0 + $0x6] sm:$0x1]   ;;  %v111_v10 = vld [vmem:[%s207_s0 + $0x5] sm:$0x1]   ;;  %s140_s8 = smov 24  }
   0x6   :  { %s141_s9 = smov 20   ;;  %v112_v11 = vld [vmem:[%s207_s0 + $0x4] sm:$0x1]   ;;  %s142_s12 = smov 16   ;;  %v113_v12 = vld [vmem:[%s207_s0 + $0x3] sm:$0x1]  }
   0x7   :  { %v114_v13 = vld [vmem:[%s207_s0 + $0x2] sm:$0x1]   ;;  %s143_s17 = smov 12   ;;  %s144_s18 = smov 8   ;;  %v115_v14 = vld [vmem:[%s207_s0 + $0x1] sm:$0x1]  }
   0x8   :  { %s145_s21 = smov 4   ;;  %v2_v15 = vld [vmem:[%s207_s0] sm:$0x1]   ;;  %vm27_vm4 = vcmask 425344   ;;  %vm33_vm5 = vcmask 392544   ;;  %vm39_vm6 = vcmask 359744  }
   0x9   :  { %4 = vst.msk [vmem:[#allocation0] sm:$0x1] %vm3_vm0, %v2_v15   ;;  %vm45_vm7 = vcmask 326944   ;;  %vm51_vm8 = vcmask 294144   ;;  %vm57_vm9 = vcmask 261344   ;;  %vm63_vm10 = vcmask 228544  }
   0xa   :  { %13 = vrot.lane.b32.xlu0 %v102_v3, %s134_s19  ;;  %25 = vrot.lane.b32.xlu1 %v104_v4, %s135_s20  ;;  %vm69_vm11 = vcmask 195744   ;;  %vm75_vm12 = vcmask 162944   ;;  %vm81_vm13 = vcmask 130144   ;;  %vm87_vm14 = vcmask 97344  }
   0xb   :  { %37 = vrot.lane.b32.xlu2 %v106_v5, %s136_s23  ;;  %vm93_vm15 = vcmask 64544  }
  0x12   :  { %43 = vrot.lane.b32.xlu0 %v107_v6, %s137_s28  ;;  %49 = vrot.lane.b32.xlu1 %v108_v7, %s138_s29 }
  0x13   :  { %55 = vrot.lane.b32.xlu2 %v109_v8, %s139_s3 }
  0x1a   :  { %61 = vrot.lane.b32.xlu0 %v110_v9, %s140_s8  ;;  %67 = vrot.lane.b32.xlu1 %v111_v10, %s141_s9 }
  0x1b   :  { %73 = vrot.lane.b32.xlu2 %v112_v11, %s142_s12 }
  0x22   :  { %79 = vrot.lane.b32.xlu0 %v113_v12, %s143_s17  ;;  %85 = vrot.lane.b32.xlu1 %v114_v13, %s144_s18 }
  0x23   :  { %91 = vrot.lane.b32.xlu2 %v115_v14, %s145_s21 }
  0x5d   :  { %v32_v16 = vpop.permute.xlu2 %31  }
  0x65   :  { %v38_v17 = vpop.permute.xlu2 %37  }
  0x6d   :  { %v56_v18 = vpop.permute.xlu2 %55  }
  0x74   :  { %v8_v19 = vpop.permute.xlu0 %7   ;;  %v20_v20 = vpop.permute.xlu1 %19  }
  0x75   :  { %10 = vst.msk [vmem:[#allocation0] sm:$0x1] %vm9_vm1, %v8_v19   ;;  %v74_v21 = vpop.permute.xlu2 %73  }
  0x7c   :  { %v14_v22 = vpop.permute.xlu0 %13   ;;  %v26_v23 = vpop.permute.xlu1 %25  }
  0x7d   :  { %16 = vst.msk [vmem:[#allocation0] sm:$0x1] %vm15_vm2, %v14_v22   ;;  %v92_v24 = vpop.permute.xlu2 %91  }
  0x7e   :  { %22 = vst.msk [vmem:[#allocation0] sm:$0x1] %vm21_vm3, %v20_v20  }
  0x7f   :  { %28 = vst.msk [vmem:[#allocation0] sm:$0x1] %vm27_vm4, %v26_v23  }
  0x80   :  { %34 = vst.msk [vmem:[#allocation0] sm:$0x1] %vm33_vm5, %v32_v16  }
  0x81   :  { %40 = vst.msk [vmem:[#allocation0] sm:$0x1] %vm39_vm6, %v38_v17  }
  0x84   :  { %v44_v25 = vpop.permute.xlu0 %43   ;;  %v50_v26 = vpop.permute.xlu1 %49  }
  0x85   :  { %46 = vst.msk [vmem:[#allocation0] sm:$0x1] %vm45_vm7, %v44_v25  }
  0x86   :  { %52 = vst.msk [vmem:[#allocation0] sm:$0x1] %vm51_vm8, %v50_v26  }
  0x87   :  { %58 = vst.msk [vmem:[#allocation0] sm:$0x1] %vm57_vm9, %v56_v18  }
  0x8c   :  { %v62_v27 = vpop.permute.xlu0 %61   ;;  %v68_v28 = vpop.permute.xlu1 %67  }
  0x8d   :  { %64 = vst.msk [vmem:[#allocation0] sm:$0x1] %vm63_vm10, %v62_v27  }
  0x8e   :  { %70 = vst.msk [vmem:[#allocation0] sm:$0x1] %vm69_vm11, %v68_v28  }
  0x8f   :  { %76 = vst.msk [vmem:[#allocation0] sm:$0x1] %vm75_vm12, %v74_v21  }
  0x94   :  { %v80_v29 = vpop.permute.xlu0 %79   ;;  %v86_v30 = vpop.permute.xlu1 %85  }
  0x95   :  { %82 = vst.msk [vmem:[#allocation0] sm:$0x1] %vm81_vm13, %v80_v29  }
  0x96   :  { %88 = vst.msk [vmem:[#allocation0] sm:$0x1] %vm87_vm14, %v86_v30  }
  0x97   :  { %94 = vst.msk [vmem:[#allocation0] sm:$0x1] %vm93_vm15, %v92_v24  }
  0x9e   :  { %v97_v31 = vld [vmem:[#allocation0] sm:$0x1] }
  0x9f   :  { %100 = vst [vmem:[%s208_s1] sm:$0x1] %v97_v31 }

// kernel: tile.28
= control target key start
LH: loop header
LB: loop body
LE: loop exit
PB: predicated region body
PF: predicated region fallthrough
CT: control target
= control target key end

     0   :  { %s28_s0 = inlined_call_operand.vmem [shape: f32[8], index: 0, kind: input, shape index: {}]   ;;  %s29_s1 = inlined_call_operand.vmem [shape: f32[16,8], index: 1, kind: output, shape index: {}]  }
   0x1   :  { %v4_v0 = vld [vmem:[%s28_s0] ss:$0 sm:$0xff] }
   0x2   :  { %5 = vst [vmem:[%s29_s1] sm:$0xff] %v4_v0 }
   0x3   :  { %8 = vst [vmem:[%s29_s1 + $0x8] sm:$0xff] %v4_v0 }

// kernel: tile.29
= control target key start
LH: loop header
LB: loop body
LE: loop exit
PB: predicated region body
PF: predicated region fallthrough
CT: control target
= control target key end

     0   :  { %s131_s10 = smov 120   ;;  %s132_s11 = smov 104   ;;  %vm3_vm0 = vcmask 64512   ;;  %vm9_vm1 = vcmask 1048512   ;;  %vm15_vm2 = vcmask 982912   ;;  %vm21_vm3 = vcmask 917312   ;;  %s207_s0 = inlined_call_operand.vmem [shape: f32[16,8], index: 0, kind: input, shape index: {}]   ;;  %s208_s1 = inlined_call_operand.vmem [shape: f32[1,128], index: 1, kind: output, shape index: {}]  }
   0x1   :  { %v101_v0 = vld [vmem:[%s207_s0 + $0xf] sm:$0x1]   ;;  %v103_v1 = vld [vmem:[%s207_s0 + $0xd] sm:$0x1]   ;;  %v105_v2 = vld [vmem:[%s207_s0 + $0xb] sm:$0x1]  }
   0x2   :  { %7 = vrot.lane.b32.xlu0 %v101_v0, %s131_s10  ;;  %19 = vrot.lane.b32.xlu1 %v103_v1, %s132_s11  ;;  %s133_s14 = smov 88   ;;  %v102_v3 = vld [vmem:[%s207_s0 + $0xe] sm:$0x1]   ;;  %v104_v4 = vld [vmem:[%s207_s0 + $0xc] sm:$0x1]   ;;  %s134_s19 = smov 112  }
   0x3   :  { %31 = vrot.lane.b32.xlu2 %v105_v2, %s133_s14  ;;  %s135_s20 = smov 96   ;;  %v106_v5 = vld [vmem:[%s207_s0 + $0xa] sm:$0x1]   ;;  %s136_s23 = smov 80   ;;  %v107_v6 = vld [vmem:[%s207_s0 + $0x9] sm:$0x1]  }
   0x4   :  { %v108_v7 = vld [vmem:[%s207_s0 + $0x8] sm:$0x1]   ;;  %s137_s28 = smov 72   ;;  %s138_s29 = smov 64   ;;  %v109_v8 = vld [vmem:[%s207_s0 + $0x7] sm:$0x1]  }
   0x5   :  { %s139_s3 = smov 56   ;;  %v110_v9 = vld [vmem:[%s207_s0 + $0x6] sm:$0x1]   ;;  %v111_v10 = vld [vmem:[%s207_s0 + $0x5] sm:$0x1]   ;;  %s140_s8 = smov 48  }
   0x6   :  { %s141_s9 = smov 40   ;;  %v112_v11 = vld [vmem:[%s207_s0 + $0x4] sm:$0x1]   ;;  %s142_s12 = smov 32   ;;  %v113_v12 = vld [vmem:[%s207_s0 + $0x3] sm:$0x1]  }
   0x7   :  { %v114_v13 = vld [vmem:[%s207_s0 + $0x2] sm:$0x1]   ;;  %s143_s17 = smov 24   ;;  %s144_s18 = smov 16   ;;  %v115_v14 = vld [vmem:[%s207_s0 + $0x1] sm:$0x1]  }
   0x8   :  { %s145_s21 = smov 8   ;;  %v2_v15 = vld [vmem:[%s207_s0] sm:$0x1]   ;;  %vm27_vm4 = vcmask 851712   ;;  %vm33_vm5 = vcmask 786112   ;;  %vm39_vm6 = vcmask 720512  }
   0x9   :  { %4 = vst.msk [vmem:[#allocation0] sm:$0x1] %vm3_vm0, %v2_v15   ;;  %vm45_vm7 = vcmask 654912   ;;  %vm51_vm8 = vcmask 589312   ;;  %vm57_vm9 = vcmask 523712   ;;  %vm63_vm10 = vcmask 458112  }
   0xa   :  { %13 = vrot.lane.b32.xlu0 %v102_v3, %s134_s19  ;;  %25 = vrot.lane.b32.xlu1 %v104_v4, %s135_s20  ;;  %vm69_vm11 = vcmask 392512   ;;  %vm75_vm12 = vcmask 326912   ;;  %vm81_vm13 = vcmask 261312   ;;  %vm87_vm14 = vcmask 195712  }
   0xb   :  { %37 = vrot.lane.b32.xlu2 %v106_v5, %s136_s23  ;;  %vm93_vm15 = vcmask 130112  }
  0x12   :  { %43 = vrot.lane.b32.xlu0 %v107_v6, %s137_s28  ;;  %49 = vrot.lane.b32.xlu1 %v108_v7, %s138_s29 }
  0x13   :  { %55 = vrot.lane.b32.xlu2 %v109_v8, %s139_s3 }
  0x1a   :  { %61 = vrot.lane.b32.xlu0 %v110_v9, %s140_s8  ;;  %67 = vrot.lane.b32.xlu1 %v111_v10, %s141_s9 }
  0x1b   :  { %73 = vrot.lane.b32.xlu2 %v112_v11, %s142_s12 }
  0x22   :  { %79 = vrot.lane.b32.xlu0 %v113_v12, %s143_s17  ;;  %85 = vrot.lane.b32.xlu1 %v114_v13, %s144_s18 }
  0x23   :  { %91 = vrot.lane.b32.xlu2 %v115_v14, %s145_s21 }
  0x5d   :  { %v32_v16 = vpop.permute.xlu2 %31  }
  0x65   :  { %v38_v17 = vpop.permute.xlu2 %37  }
  0x6d   :  { %v56_v18 = vpop.permute.xlu2 %55  }
  0x74   :  { %v8_v19 = vpop.permute.xlu0 %7   ;;  %v20_v20 = vpop.permute.xlu1 %19  }
  0x75   :  { %10 = vst.msk [vmem:[#allocation0] sm:$0x1] %vm9_vm1, %v8_v19   ;;  %v74_v21 = vpop.permute.xlu2 %73  }
  0x7c   :  { %v14_v22 = vpop.permute.xlu0 %13   ;;  %v26_v23 = vpop.permute.xlu1 %25  }
  0x7d   :  { %16 = vst.msk [vmem:[#allocation0] sm:$0x1] %vm15_vm2, %v14_v22   ;;  %v92_v24 = vpop.permute.xlu2 %91  }
  0x7e   :  { %22 = vst.msk [vmem:[#allocation0] sm:$0x1] %vm21_vm3, %v20_v20  }
  0x7f   :  { %28 = vst.msk [vmem:[#allocation0] sm:$0x1] %vm27_vm4, %v26_v23  }
  0x80   :  { %34 = vst.msk [vmem:[#allocation0] sm:$0x1] %vm33_vm5, %v32_v16  }
  0x81   :  { %40 = vst.msk [vmem:[#allocation0] sm:$0x1] %vm39_vm6, %v38_v17  }
  0x84   :  { %v44_v25 = vpop.permute.xlu0 %43   ;;  %v50_v26 = vpop.permute.xlu1 %49  }
  0x85   :  { %46 = vst.msk [vmem:[#allocation0] sm:$0x1] %vm45_vm7, %v44_v25  }
  0x86   :  { %52 = vst.msk [vmem:[#allocation0] sm:$0x1] %vm51_vm8, %v50_v26  }
  0x87   :  { %58 = vst.msk [vmem:[#allocation0] sm:$0x1] %vm57_vm9, %v56_v18  }
  0x8c   :  { %v62_v27 = vpop.permute.xlu0 %61   ;;  %v68_v28 = vpop.permute.xlu1 %67  }
  0x8d   :  { %64 = vst.msk [vmem:[#allocation0] sm:$0x1] %vm63_vm10, %v62_v27  }
  0x8e   :  { %70 = vst.msk [vmem:[#allocation0] sm:$0x1] %vm69_vm11, %v68_v28  }
  0x8f   :  { %76 = vst.msk [vmem:[#allocation0] sm:$0x1] %vm75_vm12, %v74_v21  }
  0x94   :  { %v80_v29 = vpop.permute.xlu0 %79   ;;  %v86_v30 = vpop.permute.xlu1 %85  }
  0x95   :  { %82 = vst.msk [vmem:[#allocation0] sm:$0x1] %vm81_vm13, %v80_v29  }
  0x96   :  { %88 = vst.msk [vmem:[#allocation0] sm:$0x1] %vm87_vm14, %v86_v30  }
  0x97   :  { %94 = vst.msk [vmem:[#allocation0] sm:$0x1] %vm93_vm15, %v92_v24  }
  0x9e   :  { %v97_v31 = vld [vmem:[#allocation0] sm:$0x1] }
  0x9f   :  { %100 = vst [vmem:[%s208_s1] sm:$0x1] %v97_v31 }

// kernel: bn_relu_conv.1
= control target key start
LH: loop header
LB: loop body
LE: loop exit
PB: predicated region body
PF: predicated region fallthrough
CT: control target
= control target key end

     0   :  { %vm77_vm0 = vcmask 1040384   ;;  %vm78_vm1 = vsmask.f32 256  ;;  %vm117_vm3 = vcmask 1046528   ;;  %vm124_vm4 = vcmask 523264   ;;  %s357_s24 = smov 64   ;;  %s465_s0 = inlined_call_operand.vmem [shape: f32[2,16,64], index: 0, kind: input, shape index: {}]   ;;  %s466_s1 = inlined_call_operand.vmem [shape: f32[1,64], index: 1, kind: input, shape index: {}]   ;;  %s467_s2 = inlined_call_operand.vmem [shape: f32[1,64], index: 2, kind: input, shape index: {}]   ;;  %s468_s3 = inlined_call_operand.vmem [shape: bf16[192,128], index: 3, kind: input, shape index: {}]   ;;  %s469_s4 = inlined_call_operand.vmem [shape: f32[1,128], index: 4, kind: input, shape index: {}]   ;;  %s470_s5 = inlined_call_operand.vmem [shape: f32[2,16,128], index: 5, kind: output, shape index: {}]  }
   0x1   :  { %v23_v0 = vld [vmem:[%s465_s0 + $0x10] sm:$0xff]  ;;  %v24_v1 = vld [vmem:[%s465_s0 + $0x18] sm:$0xff]  ;;  %v354_v2 = vld [vmem:[%s466_s1] ss:$0 sm:$0xff]  ;;  %vm84_vm5 = vsmask.f32 7424 }
   0x2   :  { %v355_v3 = vld [vmem:[%s467_s2] ss:$0 sm:$0xff]  ;;  %v22_v5 = vld [vmem:[%s465_s0 + $0x8] sm:$0xff]  ;;  %v31_v6 = vmul.f32 %v354_v2, %v23_v0  ;;  %v32_v7 = vmul.f32 %v354_v2, %v24_v1  ;;  %v340_v14 = vld [vmem:[%s468_s3 + $0x38] sm:$0xff] }
   0x3   :  { %v21_v4 = vld [vmem:[%s465_s0] sm:$0xff]  ;;  %v30_v9 = vmul.f32 %v354_v2, %v22_v5  ;;  %v344_v15 = vld [vmem:[%s468_s3 + $0x58] sm:$0xff]  ;;  %345 = vmatpush.bf16.msra.mxu2 %v340_v14  ;;  %v339_v20 = vld [vmem:[%s468_s3 + $0x30] sm:$0xff]  ;;  %237 = vmatpush.bf16.msra.mxu0 %v340_v14 }
   0x4   :  { %v29_v8 = vmul.f32 %v354_v2, %v21_v4  ;;  %v39_v10 = vadd.f32 %v355_v3, %v31_v6  ;;  %v40_v11 = vadd.f32 %v355_v3, %v32_v7  ;;  %260 = vmatpush.bf16.msra.mxu1 %v344_v15  ;;  %v343_v21 = vld [vmem:[%s468_s3 + $0x50] sm:$0xff]  ;;  %v338_v30 = vld [vmem:[%s468_s3 + $0x28] sm:$0xff]  ;;  %v337_v38 = vld [vmem:[%s468_s3 + $0x20] sm:$0xff] }
   0x5   :  { %v38_v13 = vadd.f32 %v355_v3, %v30_v9  ;;  %v342_v31 = vld [vmem:[%s468_s3 + $0x48] sm:$0xff]  ;;  %v341_v39 = vld [vmem:[%s468_s3 + $0x40] sm:$0xff]  ;;  %vm79_vm2 = vmand %vm77_vm0, %vm78_vm1 }
   0x6   :  { %v37_v12 = vadd.f32 %v355_v3, %v29_v8  ;;  %v43_v16 = vmax.f32 %v39_v10, 0.0  ;;  %v44_v17 = vmax.f32 %v40_v11, 0.0  ;;  %v336_v45 = vld [vmem:[%s468_s3 + $0x18] sm:$0xff]  ;;  %v335_v55 = vld [vmem:[%s468_s3 + $0x10] sm:$0xff]  ;;  %v334_v63 = vld [vmem:[%s468_s3 + $0x8] sm:$0xff] }
   0x7   :  { %v42_v19 = vmax.f32 %v38_v13, 0.0  ;;  %346 = vmatpush.bf16.msra.mxu2 %v339_v20  ;;  %238 = vmatpush.bf16.msra.mxu0 %v339_v20  ;;  %v333_v3 = vld [vmem:[%s468_s3] sm:$0xff] }
   0x8   :  { %v41_v18 = vmax.f32 %v37_v12, 0.0  ;;  %v47_v22 = vpack.c.bf16 %v43_v16, %v43_v16  ;;  %v48_v23 = vpack.c.bf16 %v44_v17, %v44_v17  ;;  %261 = vmatpush.bf16.msra.mxu1 %v343_v21  ;;  %v356_v14 = vld [vmem:[%s469_s4] ss:$0 sm:$0xff] }
   0x9   :  { %v46_v25 = vpack.c.bf16 %v42_v19, %v42_v19 }
   0xa   :  { %v45_v24 = vpack.c.bf16 %v41_v18, %v41_v18  ;;  %v55_v26 = vunpack.c.l.b16 %v47_v22  ;;  %v56_v27 = vunpack.c.l.b16 %v48_v23 }
   0xb   :  { %v54_v29 = vunpack.c.l.b16 %v46_v25  ;;  %347 = vmatpush.bf16.msra.mxu2 %v338_v30  ;;  %239 = vmatpush.bf16.msra.mxu0 %v338_v30 }
   0xc   :  { %v53_v28 = vunpack.c.l.b16 %v45_v24  ;;  %v58_v32 = vpack.c.b16 %v56_v27, %v55_v26  ;;  %262 = vmatpush.bf16.msra.mxu1 %v342_v31 }
   0xe   :  { %v57_v33 = vpack.c.b16 %v54_v29, %v53_v28  ;;  %v67_v34 = vshrl.u32 %v58_v32, 16  ;;  %v70_v35 = vshll.u32 %v58_v32, 16 }
   0xf   :  { %348 = vmatpush.bf16.msra.mxu2 %v337_v38  ;;  %240 = vmatpush.bf16.msra.mxu0 %v337_v38 }
  0x10   :  { %v60_v36 = vshrl.u32 %v57_v33, 16  ;;  %v63_v37 = vshll.u32 %v57_v33, 16  ;;  %v69_v40 = vrot.slane %v67_v34, 7  ;;  %263 = vmatpush.bf16.msra.mxu1 %v341_v39 }
  0x12   :  { %v62_v41 = vrot.slane %v60_v36, 7  ;;  %v72_v42 = vor.u32 %v70_v35, %v69_v40  ;;  %v83_v43 = vsel %vm79_vm2, %v69_v40, 0 }
  0x13   :  { %v105_v46 = vshll.u32 %v83_v43, 16  ;;  %349 = vmatpush.bf16.msra.mxu2 %v336_v45  ;;  %241 = vmatpush.bf16.msra.mxu0 %v336_v45  ;;  %v122_v6 = vrot.slane %v83_v43, 1 }
  0x14   :  { %v65_v44 = vor.u32 %v63_v37, %v62_v41  ;;  %v82_v47 = vsel %vm79_vm2, %v62_v41, 0  ;;  %v81_v48 = vsel %vm79_vm2, 0, %v72_v42 }
  0x15   :  { %v119_v50 = vrot.slane %v82_v47, 1  ;;  %v98_v51 = vshrl.u32 %v81_v48, 16  ;;  %v100_v52 = vshll.u32 %v81_v48, 16  ;;  %v107_v57 = vrot.slane %v105_v46, 1 }
  0x16   :  { %v80_v49 = vsel %vm79_vm2, 0, %v65_v44  ;;  %v93_v62 = vshll.u32 %v82_v47, 16  ;;  %v121_v5 = vrot.slane %v81_v48, 1 }
  0x17   :  { %v88_v53 = vshll.u32 %v80_v49, 16  ;;  %v118_v54 = vrot.slane %v80_v49, 1  ;;  %v102_v56 = vrot.slane %v100_v52, 1  ;;  %v86_v60 = vshrl.u32 %v80_v49, 16  ;;  %350 = vmatpush.bf16.msra.mxu2 %v335_v55  ;;  %242 = vmatpush.bf16.msra.mxu0 %v335_v55 }
  0x18   :  { %v95_v2 = vrot.slane %v93_v62, 1  ;;  %v123_v7 = vsel %vm117_vm3, %v121_v5, %v122_v6 }
  0x19   :  { %v120_v58 = vsel %vm117_vm3, %v118_v54, %v119_v50  ;;  %v103_v59 = vor.u32 %v102_v56, %v98_v51  ;;  %v90_v61 = vrot.slane %v88_v53, 1 }
  0x1a   :  { %331 = vmatmul.msk.bf16.vlgmr.msra.gmra.mxu1 %vm124_vm4, %v120_v58 }
  0x1b   :  { %v108_v0 = vsel %vm84_vm5, %v103_v59, %v107_v57  ;;  %v91_v1 = vor.u32 %v90_v61, %v86_v60  ;;  %351 = vmatpush.bf16.msra.mxu2 %v334_v63  ;;  %243 = vmatpush.bf16.msra.mxu0 %v334_v63 }
  0x1c   :  { %111 = vrot.lane.b32.xlu0 %v108_v0, %s357_s24 }
  0x1d   :  { %v96_v4 = vsel %vm84_vm5, %v91_v1, %v95_v2 }
  0x1f   :  { %352 = vmatpush.bf16.msra.mxu2 %v333_v3  ;;  %244 = vmatpush.bf16.msra.mxu0 %v333_v3 }
  0x24   :  { %109 = vrot.lane.b32.xlu0 %v96_v4, %s357_s24 }
  0x2a   :  { %332 = vmatmul.msk.bf16.gmra.mxu1 %vm124_vm4, %v123_v7 }
  0x8e   :  { %v112_v8 = vpop.permute.xlu0 %111 }
  0x8f   :  { %v129_v9 = vsel %vm124_vm4, %v81_v48, %v112_v8 }
  0x90   :  { %250 = vmatmul.bf16.vlgmr.msra.gmra.mxu2 %v129_v9 }
  0x96   :  { %v110_v10 = vpop.permute.xlu0 %109 }
  0x97   :  { %v126_v11 = vsel %vm124_vm4, %v80_v49, %v110_v10  ;;  %v265_v12 = vpop.f32.mrf.mxu1 }
  0x98   :  { %245 = vmatmul.bf16.vlgmr.msra.gmra.mxu0 %v126_v11 }
  0x9f   :  { %v267_v13 = vpop.f32.mrf.mxu1 }
  0xa7   :  { %v270_v15 = vpop.f32.mrf.mxu1 }
  0xaf   :  { %v272_v24 = vpop.f32.mrf.mxu1 }
 0x113   :  { %v251_v16 = vpop.f32.mrf.mxu2 }
 0x114   :  { %v252_v17 = vadd.f32 %v356_v14, %v251_v16 }
 0x115   :  { %v246_v18 = vpop.f32.mrf.mxu0 }
 0x116   :  { %v271_v19 = vadd.f32 %v270_v15, %v252_v17  ;;  %v247_v20 = vadd.f32 %v356_v14, %v246_v18 }
 0x118   :  { %277 = vst [vmem:[%s470_s5 + $0x10] sm:$0xff] %v271_v19  ;;  %v266_v21 = vadd.f32 %v265_v12, %v247_v20 }
 0x11a   :  { %275 = vst [vmem:[%s470_s5] sm:$0xff] %v266_v21 }
 0x11b   :  { %v253_v22 = vpop.f32.mrf.mxu2 }
 0x11c   :  { %v254_v23 = vadd.f32 %v356_v14, %v253_v22 }
 0x11d   :  { %v248_v25 = vpop.f32.mrf.mxu0 }
 0x11e   :  { %v273_v26 = vadd.f32 %v272_v24, %v254_v23  ;;  %v249_v27 = vadd.f32 %v356_v14, %v248_v25 }
 0x120   :  { %278 = vst [vmem:[%s470_s5 + $0x18] sm:$0xff] %v273_v26  ;;  %v268_v28 = vadd.f32 %v267_v13, %v249_v27 }
 0x122   :  { %276 = vst [vmem:[%s470_s5 + $0x8] sm:$0xff] %v268_v28 }

</bundles_post_ra>
